<compile_context>
chip_gen: v7x
topology: tpu7x:2x2x1
jax: 0.10.0
libtpu: 0.0.40
codegen_flags: <defaults>
</compile_context>

<pallas_src>
import jax
import jax.numpy as jnp
from jax.experimental import pallas as pl
from jax.experimental.pallas import tpu as pltpu

LANE = 128


def _cdiv(a, b):
    return -(-a // b)


def _round_up(n, m):
    return _cdiv(n, m) * m


def _sum_rows(a):
    """Sum over axis 0 (sublanes), keepdims. Pairwise halving -> pure slices + VPU adds."""
    while a.shape[0] > 1 and a.shape[0] % 2 == 0:
        h = a.shape[0] // 2
        a = a[:h, :] + a[h:, :]
    if a.shape[0] > 1:  # not hit for power-of-two hidden sizes (64 here)
        a = jnp.sum(a, axis=0, keepdims=True)
    return a


def _mlp_kernel(xT_ref, w1_ref, b1_ref, w2_ref, b2_ref, w3t_ref, b3_ref, oT_ref):
    # Batch lives on the 128-lane axis everywhere; weights/biases are VMEM-resident.
    xT = xT_ref[...]                                   # (in_dim, Bt) f32
    in_dim = xT.shape[0]

    # ---- Layer 1 on the VPU (f32): K = in_dim = 4 outer-product MACs. ----
    w1 = w1_ref[...]                                   # (hid, in_dim) f32
    acc = w1[:, 0:1] * xT[0:1, :]                      # (hid,1)*(1,Bt) -> (hid,Bt)
    for k in range(1, in_dim):                         # static python loop (in_dim=4)
        acc = acc + w1[:, k:k + 1] * xT[k:k + 1, :]
    h1 = jnp.maximum(acc + b1_ref[...], 0.0)           # (hid, Bt) f32

    # ---- Layer 2 on the MXU: bf16 operands, f32 accumulation; f32 epilogue. ----
    h2 = jnp.dot(w2_ref[...], h1.astype(jnp.bfloat16),
                 preferred_element_type=jnp.float32)   # (hid, Bt) f32
    h2 = jnp.maximum(h2 + b2_ref[...], 0.0)

    # ---- Layer 3 on the VPU (f32): M = out_dim = 2 rows, pairwise row sums. ----
    w3t = w3t_ref[...]                                 # (hid, out_dim) f32
    b3 = b3_ref[...]                                   # (out_dim, 1) f32
    out_dim = b3.shape[0]
    for j in range(out_dim):                           # static python loop (out_dim=2)
        row = _sum_rows(w3t[:, j:j + 1] * h2)          # (1, Bt) f32
        oT_ref[j:j + 1, :] = (row + b3[j:j + 1, :]).astype(oT_ref.dtype)


def imitation_net_forward(x, params, *, batch_tile=2048, feature_major=False):
    """Fused ImitationNet forward.

    x: (B, input_size) f32 (module semantics), or (input_size, B) if feature_major=True.
    params: PyTorch layout — weights w{1,2,3} (out_features, in_features), biases b* (out_features, 1).
    Returns (B, output_size) f32.
    """
    if feature_major:
        in_dim, B = x.shape
        xT = x.astype(jnp.float32)
    else:
        B, in_dim = x.shape
        # TODO(synk): fold this (B,in)->(in,B) relayout into the kernel once Mosaic
        # transpose of a 4-wide minor dim is guaranteed; feature-major callers should
        # pass feature_major=True and skip it entirely.
        xT = x.astype(jnp.float32).T                   # (in_dim, B)

    hid = params["w1"].shape[0]
    out_dim = params["w3"].shape[0]

    # Balanced, 128-aligned batch tiles; >= 2 tiles (even count) so the "parallel" grid
    # axis keeps both v7x TensorCores busy; padding waste bounded by < 128 rows/tile.
    n_tiles = max(2, _cdiv(B, batch_tile))
    if n_tiles % 2:
        n_tiles += 1
    tile = _round_up(_cdiv(B, n_tiles), LANE)
    B_pad = n_tiles * tile

    xT = jnp.pad(xT, ((0, 0), (0, B_pad - B)))         # (in_dim, B_pad)

    # Operand prep (tiny, < 20 KiB total): only the MXU operand w2 goes bf16; VPU math
    # and bias/ReLU epilogues stay f32 (v5e has no bf16 VPU). w3 is passed transposed
    # (hid, out) so the kernel slices natural (hid, 1) columns.
    w1 = params["w1"].astype(jnp.float32)              # (hid, in_dim)
    b1 = params["b1"].astype(jnp.float32)              # (hid, 1)
    w2 = params["w2"].astype(jnp.bfloat16)             # (hid, hid)   MXU operand
    b2 = params["b2"].astype(jnp.float32)              # (hid, 1)
    w3t = params["w3"].astype(jnp.float32).T           # (hid, out_dim)
    b3 = params["b3"].astype(jnp.float32)              # (out_dim, 1)

    x_spec = pl.BlockSpec((in_dim, tile), lambda i: (0, i))
    o_spec = pl.BlockSpec((out_dim, tile), lambda i: (0, i))
    # Constant-index blocks: DMA'd once, resident across the grid. (pl.Buffered(1) would
    # only shave ~17 KiB of the redundant second buffer; intentionally left at default.)
    full = lambda a: pl.BlockSpec(a.shape, lambda i: (0, 0))

    flops = 2 * B_pad * (in_dim * hid + hid * hid + hid * out_dim)
    param_bytes = int(w1.size + b1.size + b2.size + w3t.size + b3.size) * 4 + int(w2.size) * 2
    bytes_accessed = B_pad * (in_dim + out_dim) * 4 + param_bytes
    cost = pl.CostEstimate(flops=int(flops), transcendentals=0,
                           bytes_accessed=int(bytes_accessed))

    outT = pl.pallas_call(
        _mlp_kernel,
        out_shape=jax.ShapeDtypeStruct((out_dim, B_pad), jnp.float32),
        grid_spec=pltpu.PrefetchScalarGridSpec(
            num_scalar_prefetch=0,
            grid=(n_tiles,),
            in_specs=[x_spec, full(w1), full(b1), full(w2), full(b2), full(w3t), full(b3)],
            out_specs=o_spec,
        ),
        compiler_params=pltpu.CompilerParams(
            dimension_semantics=("parallel",),          # batch tiles shard across TCs
        ),
        cost_estimate=cost,
    )(xT, w1, b1, w2, b2, w3t, b3)

    return outT[:, :B].T                                # back to (B, out_dim)


def init_params(key, input_size=4, hidden_size=64, output_size=2):
    """Deterministic init mimicking nn.Linear's U(-1/sqrt(fan_in), 1/sqrt(fan_in)).

    PyTorch-native layout: weights (out_features, in_features), biases (out_features, 1).
    """
    ks = jax.random.split(key, 6)

    def lin(kw, kb, fan_in, fan_out):
        bound = 1.0 / jnp.sqrt(fan_in)
        w = jax.random.uniform(kw, (fan_out, fan_in), jnp.float32, -bound, bound)
        b = jax.random.uniform(kb, (fan_out, 1), jnp.float32, -bound, bound)
        return w, b

    w1, b1 = lin(ks[0], ks[1], input_size, hidden_size)
    w2, b2 = lin(ks[2], ks[3], hidden_size, hidden_size)
    w3, b3 = lin(ks[4], ks[5], hidden_size, output_size)
    return {"w1": w1, "b1": b1, "w2": w2, "b2": b2, "w3": w3, "b3": b3}


def reference_forward(x, p):
    h1 = jnp.maximum(x @ p["w1"].T + p["b1"][:, 0], 0.0)
    h2 = jnp.maximum(h1 @ p["w2"].T + p["b2"][:, 0], 0.0)
    return h2 @ p["w3"].T + p["b3"][:, 0]


if __name__ == "__main__":
    key = jax.random.PRNGKey(0)
    k_x, k_p = jax.random.split(key)

    B, input_size, hidden_size, output_size = 8, 4, 64, 2
    x = jax.random.normal(k_x, (B, input_size), dtype=jnp.float32)
    params = init_params(k_p, input_size, hidden_size, output_size)

    out = jax.block_until_ready(imitation_net_forward(x, params))
    ref = reference_forward(x, params)

    assert out.shape == (B, output_size)
    # Layer 2 uses bf16 MXU operands (f32 accumulation), so the tolerance vs. the pure
    # f32 reference is loosened accordingly.
    assert jnp.allclose(out, ref, atol=3e-2, rtol=3e-2), "mismatch vs reference"

    print("KERNEL_OK")
</pallas_src>

<mosaic_0001>
module attributes {stable_mosaic.version = 11 : i64} {
  func.func @_mlp_kernel(%arg0: i32, %arg1: memref<4x128xf32, #tpu.memory_space<vmem>>, %arg2: memref<64x4xf32, #tpu.memory_space<vmem>>, %arg3: memref<64x1xf32, #tpu.memory_space<vmem>>, %arg4: memref<64x64xbf16, #tpu.memory_space<vmem>>, %arg5: memref<64x1xf32, #tpu.memory_space<vmem>>, %arg6: memref<64x2xf32, #tpu.memory_space<vmem>>, %arg7: memref<2x1xf32, #tpu.memory_space<vmem>>, %arg8: memref<2x128xf32, #tpu.memory_space<vmem>>) attributes {dimension_semantics = [#tpu.dimension_semantics<parallel>], iteration_bounds = array<i64: 2>, scalar_prefetch = 0 : i64, scratch_operands = 0 : i64, tpu.core_type = #tpu.core_type<tc>, window_params = [{transform_indices = @transform_0, window_bounds = array<i64: 4, 128>}, {pipeline_mode = #tpu.pipeline_mode<synchronous>, transform_indices = @transform_1, window_bounds = array<i64: 64, 4>}, {pipeline_mode = #tpu.pipeline_mode<synchronous>, transform_indices = @transform_2, window_bounds = array<i64: 64, 1>}, {pipeline_mode = #tpu.pipeline_mode<synchronous>, transform_indices = @transform_3, window_bounds = array<i64: 64, 64>}, {pipeline_mode = #tpu.pipeline_mode<synchronous>, transform_indices = @transform_4, window_bounds = array<i64: 64, 1>}, {pipeline_mode = #tpu.pipeline_mode<synchronous>, transform_indices = @transform_5, window_bounds = array<i64: 64, 2>}, {pipeline_mode = #tpu.pipeline_mode<synchronous>, transform_indices = @transform_6, window_bounds = array<i64: 2, 1>}, {transform_indices = @transform_7, window_bounds = array<i64: 2, 128>}]} {
    %c0 = arith.constant 0 : index
    %c0_0 = arith.constant 0 : index
    %0 = vector.load %arg1[%c0, %c0_0] : memref<4x128xf32, #tpu.memory_space<vmem>>, vector<4x128xf32>
    %c0_1 = arith.constant 0 : index
    %c0_2 = arith.constant 0 : index
    %1 = vector.load %arg2[%c0_1, %c0_2] : memref<64x4xf32, #tpu.memory_space<vmem>>, vector<64x4xf32>
    %2 = vector.extract_strided_slice %1 {offsets = [0, 0], sizes = [64, 1], strides = [1, 1]} : vector<64x4xf32> to vector<64x1xf32>
    %3 = vector.extract_strided_slice %0 {offsets = [0, 0], sizes = [1, 128], strides = [1, 1]} : vector<4x128xf32> to vector<1x128xf32>
    %4 = vector.broadcast %2 : vector<64x1xf32> to vector<64x128xf32>
    %5 = vector.broadcast %3 : vector<1x128xf32> to vector<64x128xf32>
    %6 = arith.mulf %4, %5 : vector<64x128xf32>
    %7 = vector.extract_strided_slice %1 {offsets = [0, 1], sizes = [64, 1], strides = [1, 1]} : vector<64x4xf32> to vector<64x1xf32>
    %8 = vector.extract_strided_slice %0 {offsets = [1, 0], sizes = [1, 128], strides = [1, 1]} : vector<4x128xf32> to vector<1x128xf32>
    %9 = vector.broadcast %7 : vector<64x1xf32> to vector<64x128xf32>
    %10 = vector.broadcast %8 : vector<1x128xf32> to vector<64x128xf32>
    %11 = arith.mulf %9, %10 : vector<64x128xf32>
    %12 = arith.addf %6, %11 : vector<64x128xf32>
    %13 = vector.extract_strided_slice %1 {offsets = [0, 2], sizes = [64, 1], strides = [1, 1]} : vector<64x4xf32> to vector<64x1xf32>
    %14 = vector.extract_strided_slice %0 {offsets = [2, 0], sizes = [1, 128], strides = [1, 1]} : vector<4x128xf32> to vector<1x128xf32>
    %15 = vector.broadcast %13 : vector<64x1xf32> to vector<64x128xf32>
    %16 = vector.broadcast %14 : vector<1x128xf32> to vector<64x128xf32>
    %17 = arith.mulf %15, %16 : vector<64x128xf32>
    %18 = arith.addf %12, %17 : vector<64x128xf32>
    %19 = vector.extract_strided_slice %1 {offsets = [0, 3], sizes = [64, 1], strides = [1, 1]} : vector<64x4xf32> to vector<64x1xf32>
    %20 = vector.extract_strided_slice %0 {offsets = [3, 0], sizes = [1, 128], strides = [1, 1]} : vector<4x128xf32> to vector<1x128xf32>
    %21 = vector.broadcast %19 : vector<64x1xf32> to vector<64x128xf32>
    %22 = vector.broadcast %20 : vector<1x128xf32> to vector<64x128xf32>
    %23 = arith.mulf %21, %22 : vector<64x128xf32>
    %24 = arith.addf %18, %23 : vector<64x128xf32>
    %c0_3 = arith.constant 0 : index
    %c0_4 = arith.constant 0 : index
    %25 = vector.load %arg3[%c0_3, %c0_4] : memref<64x1xf32, #tpu.memory_space<vmem>>, vector<64x1xf32>
    %26 = vector.broadcast %25 : vector<64x1xf32> to vector<64x128xf32>
    %27 = arith.addf %24, %26 : vector<64x128xf32>
    %cst = arith.constant 0.000000e+00 : f32
    %28 = vector.broadcast %cst : f32 to vector<64x128xf32>
    %29 = arith.maximumf %27, %28 : vector<64x128xf32>
    %c0_5 = arith.constant 0 : index
    %c0_6 = arith.constant 0 : index
    %30 = vector.load %arg4[%c0_5, %c0_6] : memref<64x64xbf16, #tpu.memory_space<vmem>>, vector<64x64xbf16>
    %31 = arith.truncf %29 : vector<64x128xf32> to vector<64x128xbf16>
    %cst_7 = arith.constant dense<0.000000e+00> : vector<64x128xf32>
    %32 = tpu.matmul %30, %31, %cst_7 {dimension_numbers = #tpu.dot_dimension_numbers<[1], [0], [0], [1], [0, 0, 1, 1], [], []>} : vector<64x64xbf16>, vector<64x128xbf16>, vector<64x128xf32> -> vector<64x128xf32>
    %c0_8 = arith.constant 0 : index
    %c0_9 = arith.constant 0 : index
    %33 = vector.load %arg5[%c0_8, %c0_9] : memref<64x1xf32, #tpu.memory_space<vmem>>, vector<64x1xf32>
    %34 = vector.broadcast %33 : vector<64x1xf32> to vector<64x128xf32>
    %35 = arith.addf %32, %34 : vector<64x128xf32>
    %cst_10 = arith.constant 0.000000e+00 : f32
    %36 = vector.broadcast %cst_10 : f32 to vector<64x128xf32>
    %37 = arith.maximumf %35, %36 : vector<64x128xf32>
    %c0_11 = arith.constant 0 : index
    %c0_12 = arith.constant 0 : index
    %38 = vector.load %arg6[%c0_11, %c0_12] : memref<64x2xf32, #tpu.memory_space<vmem>>, vector<64x2xf32>
    %c0_13 = arith.constant 0 : index
    %c0_14 = arith.constant 0 : index
    %39 = vector.load %arg7[%c0_13, %c0_14] : memref<2x1xf32, #tpu.memory_space<vmem>>, vector<2x1xf32>
    %40 = vector.extract_strided_slice %38 {offsets = [0, 0], sizes = [64, 1], strides = [1, 1]} : vector<64x2xf32> to vector<64x1xf32>
    %41 = vector.broadcast %40 : vector<64x1xf32> to vector<64x128xf32>
    %42 = arith.mulf %41, %37 : vector<64x128xf32>
    %43 = vector.extract_strided_slice %42 {offsets = [0, 0], sizes = [32, 128], strides = [1, 1]} : vector<64x128xf32> to vector<32x128xf32>
    %44 = vector.extract_strided_slice %42 {offsets = [32, 0], sizes = [32, 128], strides = [1, 1]} : vector<64x128xf32> to vector<32x128xf32>
    %45 = arith.addf %43, %44 : vector<32x128xf32>
    %46 = vector.extract_strided_slice %45 {offsets = [0, 0], sizes = [16, 128], strides = [1, 1]} : vector<32x128xf32> to vector<16x128xf32>
    %47 = vector.extract_strided_slice %45 {offsets = [16, 0], sizes = [16, 128], strides = [1, 1]} : vector<32x128xf32> to vector<16x128xf32>
    %48 = arith.addf %46, %47 : vector<16x128xf32>
    %49 = vector.extract_strided_slice %48 {offsets = [0, 0], sizes = [8, 128], strides = [1, 1]} : vector<16x128xf32> to vector<8x128xf32>
    %50 = vector.extract_strided_slice %48 {offsets = [8, 0], sizes = [8, 128], strides = [1, 1]} : vector<16x128xf32> to vector<8x128xf32>
    %51 = arith.addf %49, %50 : vector<8x128xf32>
    %52 = vector.extract_strided_slice %51 {offsets = [0, 0], sizes = [4, 128], strides = [1, 1]} : vector<8x128xf32> to vector<4x128xf32>
    %53 = vector.extract_strided_slice %51 {offsets = [4, 0], sizes = [4, 128], strides = [1, 1]} : vector<8x128xf32> to vector<4x128xf32>
    %54 = arith.addf %52, %53 : vector<4x128xf32>
    %55 = vector.extract_strided_slice %54 {offsets = [0, 0], sizes = [2, 128], strides = [1, 1]} : vector<4x128xf32> to vector<2x128xf32>
    %56 = vector.extract_strided_slice %54 {offsets = [2, 0], sizes = [2, 128], strides = [1, 1]} : vector<4x128xf32> to vector<2x128xf32>
    %57 = arith.addf %55, %56 : vector<2x128xf32>
    %58 = vector.extract_strided_slice %57 {offsets = [0, 0], sizes = [1, 128], strides = [1, 1]} : vector<2x128xf32> to vector<1x128xf32>
    %59 = vector.extract_strided_slice %57 {offsets = [1, 0], sizes = [1, 128], strides = [1, 1]} : vector<2x128xf32> to vector<1x128xf32>
    %60 = arith.addf %58, %59 : vector<1x128xf32>
    %61 = vector.extract_strided_slice %39 {offsets = [0, 0], sizes = [1, 1], strides = [1, 1]} : vector<2x1xf32> to vector<1x1xf32>
    %62 = vector.broadcast %61 : vector<1x1xf32> to vector<1x128xf32>
    %63 = arith.addf %60, %62 : vector<1x128xf32>
    %c0_15 = arith.constant 0 : index
    %c0_16 = arith.constant 0 : index
    %64 = vector.load %arg8[%c0_15, %c0_16] : memref<2x128xf32, #tpu.memory_space<vmem>>, vector<1x128xf32>
    tpu.vector_store %arg8[%c0_15, %c0_16], %63 {strides = array<i32>} : memref<2x128xf32, #tpu.memory_space<vmem>>, vector<1x128xf32>,
    %65 = vector.extract_strided_slice %38 {offsets = [0, 1], sizes = [64, 1], strides = [1, 1]} : vector<64x2xf32> to vector<64x1xf32>
    %66 = vector.broadcast %65 : vector<64x1xf32> to vector<64x128xf32>
    %67 = arith.mulf %66, %37 : vector<64x128xf32>
    %68 = vector.extract_strided_slice %67 {offsets = [0, 0], sizes = [32, 128], strides = [1, 1]} : vector<64x128xf32> to vector<32x128xf32>
    %69 = vector.extract_strided_slice %67 {offsets = [32, 0], sizes = [32, 128], strides = [1, 1]} : vector<64x128xf32> to vector<32x128xf32>
    %70 = arith.addf %68, %69 : vector<32x128xf32>
    %71 = vector.extract_strided_slice %70 {offsets = [0, 0], sizes = [16, 128], strides = [1, 1]} : vector<32x128xf32> to vector<16x128xf32>
    %72 = vector.extract_strided_slice %70 {offsets = [16, 0], sizes = [16, 128], strides = [1, 1]} : vector<32x128xf32> to vector<16x128xf32>
    %73 = arith.addf %71, %72 : vector<16x128xf32>
    %74 = vector.extract_strided_slice %73 {offsets = [0, 0], sizes = [8, 128], strides = [1, 1]} : vector<16x128xf32> to vector<8x128xf32>
    %75 = vector.extract_strided_slice %73 {offsets = [8, 0], sizes = [8, 128], strides = [1, 1]} : vector<16x128xf32> to vector<8x128xf32>
    %76 = arith.addf %74, %75 : vector<8x128xf32>
    %77 = vector.extract_strided_slice %76 {offsets = [0, 0], sizes = [4, 128], strides = [1, 1]} : vector<8x128xf32> to vector<4x128xf32>
    %78 = vector.extract_strided_slice %76 {offsets = [4, 0], sizes = [4, 128], strides = [1, 1]} : vector<8x128xf32> to vector<4x128xf32>
    %79 = arith.addf %77, %78 : vector<4x128xf32>
    %80 = vector.extract_strided_slice %79 {offsets = [0, 0], sizes = [2, 128], strides = [1, 1]} : vector<4x128xf32> to vector<2x128xf32>
    %81 = vector.extract_strided_slice %79 {offsets = [2, 0], sizes = [2, 128], strides = [1, 1]} : vector<4x128xf32> to vector<2x128xf32>
    %82 = arith.addf %80, %81 : vector<2x128xf32>
    %83 = vector.extract_strided_slice %82 {offsets = [0, 0], sizes = [1, 128], strides = [1, 1]} : vector<2x128xf32> to vector<1x128xf32>
    %84 = vector.extract_strided_slice %82 {offsets = [1, 0], sizes = [1, 128], strides = [1, 1]} : vector<2x128xf32> to vector<1x128xf32>
    %85 = arith.addf %83, %84 : vector<1x128xf32>
    %86 = vector.extract_strided_slice %39 {offsets = [1, 0], sizes = [1, 1], strides = [1, 1]} : vector<2x1xf32> to vector<1x1xf32>
    %87 = vector.broadcast %86 : vector<1x1xf32> to vector<1x128xf32>
    %88 = arith.addf %85, %87 : vector<1x128xf32>
    %c1 = arith.constant 1 : index
    %c0_17 = arith.constant 0 : index
    %89 = vector.load %arg8[%c1, %c0_17] : memref<2x128xf32, #tpu.memory_space<vmem>>, vector<1x128xf32>
    tpu.vector_store %arg8[%c1, %c0_17], %88 {strides = array<i32>} : memref<2x128xf32, #tpu.memory_space<vmem>>, vector<1x128xf32>,
    return
  }
  func.func @transform_0(%arg0: i32) -> (i32, i32) {
    %c0_i32 = arith.constant 0 : i32
    %c0_i32_0 = arith.constant 0 : i32
    return %c0_i32, %arg0 : i32, i32
  }
  func.func @transform_1(%arg0: i32) -> (i32, i32) {
    %c0_i32 = arith.constant 0 : i32
    %c0_i32_0 = arith.constant 0 : i32
    %c0_i32_1 = arith.constant 0 : i32
    return %c0_i32, %c0_i32_0 : i32, i32
  }
  func.func @transform_2(%arg0: i32) -> (i32, i32) {
    %c0_i32 = arith.constant 0 : i32
    %c0_i32_0 = arith.constant 0 : i32
    %c0_i32_1 = arith.constant 0 : i32
    return %c0_i32, %c0_i32_0 : i32, i32
  }
  func.func @transform_3(%arg0: i32) -> (i32, i32) {
    %c0_i32 = arith.constant 0 : i32
    %c0_i32_0 = arith.constant 0 : i32
    %c0_i32_1 = arith.constant 0 : i32
    return %c0_i32, %c0_i32_0 : i32, i32
  }
  func.func @transform_4(%arg0: i32) -> (i32, i32) {
    %c0_i32 = arith.constant 0 : i32
    %c0_i32_0 = arith.constant 0 : i32
    %c0_i32_1 = arith.constant 0 : i32
    return %c0_i32, %c0_i32_0 : i32, i32
  }
  func.func @transform_5(%arg0: i32) -> (i32, i32) {
    %c0_i32 = arith.constant 0 : i32
    %c0_i32_0 = arith.constant 0 : i32
    %c0_i32_1 = arith.constant 0 : i32
    return %c0_i32, %c0_i32_0 : i32, i32
  }
  func.func @transform_6(%arg0: i32) -> (i32, i32) {
    %c0_i32 = arith.constant 0 : i32
    %c0_i32_0 = arith.constant 0 : i32
    %c0_i32_1 = arith.constant 0 : i32
    return %c0_i32, %c0_i32_0 : i32, i32
  }
  func.func @transform_7(%arg0: i32) -> (i32, i32) {
    %c0_i32 = arith.constant 0 : i32
    %c0_i32_0 = arith.constant 0 : i32
    return %c0_i32, %arg0 : i32, i32
  }
}

</mosaic_0001>

<bundles_post_ra>
// kernel: tpu_custom_call.1
= control target key start
LH: loop header
LB: loop body
LE: loop exit
PB: predicated region body
PF: predicated region fallthrough
CT: control target
= control target key end

     0   :  { %12 = vsyncpa [#allocation3], 0  ;;  %s1491_s0 = inlined_call_operand.vmem [shape: f32[4,256], index: 0, kind: input, shape index: {}]   ;;  %s1492_s1 = inlined_call_operand.vmem [shape: f32[64,4], index: 1, kind: input, shape index: {}]   ;;  %s1493_s2 = inlined_call_operand.vmem [shape: f32[64,1], index: 2, kind: input, shape index: {}]   ;;  %s1494_s3 = inlined_call_operand.vmem [shape: bf16[64,64], index: 3, kind: input, shape index: {}]   ;;  %s1495_s4 = inlined_call_operand.vmem [shape: f32[64,1], index: 4, kind: input, shape index: {}]   ;;  %s1496_s5 = inlined_call_operand.vmem [shape: f32[64,2], index: 5, kind: input, shape index: {}]   ;;  %s1497_s6 = inlined_call_operand.vmem [shape: f32[2,1], index: 6, kind: input, shape index: {}]   ;;  %s1498_s7 = inlined_call_operand.hbm [shape: f32[2,256], index: 7, kind: output, shape index: {}]  }
   0x1   :  { %14 = vsyncpa [#allocation3 + $0x1], 0  ;;  %s1172_s24 = smov 0   ;;  %s1174_s25 = smov 0  }
   0x2   :  { %s1176_s26 = smov 0   ;;  %s1178_s27 = smov 0  }
   0x3 LB: > { %s1193_s28 = sadd.s32 4294967295, %s1125_s27   ;;  %s941_s29 = sadd.s32 4294967294, %s1125_s27   ;;  %s1125_s27 = sphi %s1178_s27, %s1504_s27   ;;  %s1121_s26 = sphi %s1176_s26, %s1503_s26   ;;  %s1117_s25 = sphi %s1174_s25, %s1502_s25   ;;  %s1113_s24 = sphi %s1172_s24, %s1501_s24  }
   0x4   : > { %s1197_s30 = sadd.s32 1, %s1125_s27   ;;  %s179_s8 = sadd.s32 1, %s1121_s26 }
   0x5   : > { %s176_s9 = ssub.s32 %s1125_s27, %s1197_s30  ;;  %p189_p0 = scmp.ne.s32.totalorder %s1121_s26, %s1117_s25 }
   0x6   : > { %p177_p1 = scmp.eq.s32.totalorder %s176_s9, 0  ;;  %p190_p2 = scmp.eq.s32.totalorder %s1193_s28, 1 }
   0x7   : > { %p195_p3 = scmp.ne.s32.totalorder %s1117_s25, %s1113_s24  ;;  %p196_p4 = scmp.eq.s32.totalorder %s941_s29, 1 }
   0x8   : > { %s1208_s10 = scalar_select %p177_p1, %s1121_s26, %s179_s8  }
   0x9   : > { %p1210_p5 = por %p190_p2, %p189_p0  ;;  %p1214_p6 = por %p196_p4, %p195_p3 }
   0xa   : > { %p944_p7 = scmp.ge.s32.totalorder %s1125_s27, 1  ;;  %p239_p8 = scmp.lt.s32.totalorder %s1125_s27, 3 }
   0xc   : > { %p240_p9 = pnand %p944_p7, %p239_p8 }
   0xd   : > { %v280_v0 = vld [vmem:[%s1492_s1 + $0x20] sm:$0xff] (!%p240_p9)  ;;  %v1127_v2 = vmov (!%p240_p9), 1   ;;  %v277_v3 = vld [vmem:[%s1492_s1 + $0x8] sm:$0xff] (!%p240_p9)  ;;  %v1128_v4 = vmov (!%p240_p9), 2   ;;  %v279_v5 = vld [vmem:[%s1492_s1 + $0x18] sm:$0xff] (!%p240_p9)  ;;  %v1129_v7 = vmov (!%p240_p9), 0   ;;  %v324_v49 = vlaneseq (!%p240_p9) }
   0xe   : > { %243 = sbr.rel (%p240_p9) target bundleno = 528 (0x210), region = 48  ;;  %v276_v1 = vld [vmem:[%s1492_s1] sm:$0xff] (!%p240_p9)  ;;  %1041 = vset.pattern.permute.xlu0 (!%p240_p9), %v1127_v2  ;;  %1034 = vset.pattern.permute.xlu1 (!%p240_p9), %v1127_v2  ;;  %v278_v6 = vld [vmem:[%s1492_s1 + $0x10] sm:$0xff] (!%p240_p9)  ;;  %v1130_v8 = vmov (!%p240_p9), 3   ;;  %v281_v10 = vld [vmem:[%s1492_s1 + $0x28] sm:$0xff] (!%p240_p9)  ;;  %vm636_vm0 = vcmask (!%p240_p9), 523264  }
   0xf   : > { %353 = vperm.xlu0 (!%p240_p9), %1041, %v280_v0   ;;  %337 = vperm.xlu1 (!%p240_p9), %1034, %v276_v1   ;;  %v282_v9 = vld [vmem:[%s1492_s1 + $0x30] sm:$0xff] (!%p240_p9)  ;;  %v283_v11 = vld [vmem:[%s1492_s1 + $0x38] sm:$0xff] (!%p240_p9)  ;;  %v497_v13 = vld [vmem:[%s1493_s2 + $0x28] sm:$0xff] (!%p240_p9)  ;;  %p270_p10 = scmp.lt.s32.totalorder (!%p240_p9), %s1193_s28, 1  ;;  %v325_v51 = vshrl.u32 (!%p240_p9), %v324_v49, 7  ;;  %s267_s22 = sand.u32 (!%p240_p9), 1, %s1117_s25  }
  0x10   : > { %v495_v12 = vld [vmem:[%s1493_s2 + $0x18] sm:$0xff] (!%p240_p9)  ;;  %v492_v14 = vld [vmem:[%s1493_s2] sm:$0xff] (!%p240_p9)  ;;  %v493_v16 = vld [vmem:[%s1493_s2 + $0x8] sm:$0xff] (!%p240_p9)  ;;  %s945_s23 = sshll.u32 (!%p240_p9), %s267_s22, 1  ;;  %s956_s29 = sshll.u32 (!%p240_p9), %s1193_s28, 5 }
  0x11   : > { %v568_v15 = vld [vmem:[%s1495_s4] sm:$0xff] (!%p240_p9)  ;;  %v570_v17 = vld [vmem:[%s1495_s4 + $0x10] sm:$0xff] (!%p240_p9)  ;;  %v725_v25 = vld [vmem:[%s1496_s5 + $0x18] sm:$0xff] (!%p240_p9)  ;;  %v370_v54 = vsub.s32 (!%p240_p9), 1, %v325_v51  ;;  %v422_v56 = vsub.s32 (!%p240_p9), 2, %v325_v51  ;;  %v326_v57 = vsub.s32 (!%p240_p9), 0, %v325_v51 }
  0x12   : > { %v572_v18 = vld [vmem:[%s1495_s4 + $0x20] sm:$0xff] (!%p240_p9)  ;;  %v574_v19 = vld [vmem:[%s1495_s4 + $0x30] sm:$0xff] (!%p240_p9)  ;;  %v727_v26 = vld [vmem:[%s1496_s5 + $0x28] sm:$0xff] (!%p240_p9)  ;;  %v474_v61 = vsub.s32 (!%p240_p9), 3, %v325_v51  ;;  %s869_s16 = scalar_lea.sflag (!%p240_p9), [#allocation3], %s267_s22  ;;  %s1131_s17 = smov (!%p240_p9), [#allocation2]  }
  0x13   : > { %1042 = vset.pattern.permute.xlu0 (!%p240_p9), %v1128_v4  ;;  %341 = vperm.xlu1 (!%p240_p9), %1034, %v277_v3   ;;  %v722_v20 = vld [vmem:[%s1496_s5] sm:$0xff] (!%p240_p9)  ;;  %v1291_v21 = vld [vmem:[%s1496_s5 + $0x10] sm:$0xff] (!%p240_p9)  ;;  %v729_v27 = vld [vmem:[%s1496_s5 + $0x38] sm:$0xff] (!%p240_p9)  ;;  %s1067_s18 = sshll.u32 (!%p240_p9), %s1131_s17, 4  ;;  %s1068_s18 = int_to_ptr.vmem [resolvable:$false] %s1067_s18 }
  0x14   : > { %389 = vperm.xlu0 (!%p240_p9), %1042, %v276_v1   ;;  %v1297_v22 = vld [vmem:[%s1496_s5 + $0x20] sm:$0xff] (!%p240_p9)  ;;  %v1304_v23 = vld [vmem:[%s1496_s5 + $0x30] sm:$0xff] (!%p240_p9)  ;;  %v499_v30 = vld [vmem:[%s1493_s2 + $0x38] sm:$0xff] (!%p240_p9)  ;;  %s1069_s19 = scalar_lea.vmem (!%p240_p9), %s1068_s18, 64 }
  0x15   : > { %v494_v24 = vld [vmem:[%s1493_s2 + $0x10] sm:$0xff]  ;;  %v496_v28 = vld [vmem:[%s1493_s2 + $0x20] sm:$0xff]  ;;  %v569_v31 = vld [vmem:[%s1495_s4 + $0x8] sm:$0xff]  ;;  %s271_s8 = scalar_select %p270_p10, %s1193_s28, 1 }
  0x16   : > { %v498_v29 = vld [vmem:[%s1493_s2 + $0x30] sm:$0xff]  ;;  %v571_v32 = vld [vmem:[%s1495_s4 + $0x18] sm:$0xff]  ;;  %v1059_v33 = vld [vmem:[%s1494_s3] sm:$0xff]  }
  0x17   : > { %1035 = vset.pattern.permute.xlu1 %v1128_v4  ;;  %v1060_v34 = vld [vmem:[%s1494_s3 + $0x10] sm:$0xff]   ;;  %v573_v35 = vld [vmem:[%s1495_s4 + $0x28] sm:$0xff]  ;;  %975 = vmatprep.mubr.msk.bf16.mxu0 %vm636_vm0, %v1059_v33  ;;  %v575_v38 = vld [vmem:[%s1495_s4 + $0x38] sm:$0xff]  ;;  %s946_s9 = sshll.u32 %s271_s8, 2  ;;  %s269_s8 = scalar_lea.vmem [#allocation2], %s945_s23 }
  0x18   : > { %401 = vperm.xlu0 %1042, %v279_v5   ;;  %393 = vperm.xlu1 %1035, %v277_v3   ;;  %v723_v41 = vld [vmem:[%s1496_s5 + $0x8] sm:$0xff]  ;;  %s273_s15 = scalar_lea.vmem %s1491_s0, %s946_s9  ;;  %s882_s9 = sshll.u32 %s269_s8, 4  ;;  %s1451_s9 = int_to_ptr.vmem [resolvable:$true] %s882_s9 }
  0x19   : > { %979 = vmatprep.mubr.msk.bf16.mxu1 %vm636_vm0, %v1060_v34  ;;  %v275_v55 = vld [vmem:[%s273_s15] sm:$0xf]  ;;  %s1449_s15 = scalar_lea.hbm %s1498_s7, %s956_s29  ;;  %s1063_s28 = scalar_lea.vmem %s1451_s9, 32 }
  0x1a   : > { %v1377_v60 = vrot.slane %v275_v55, %v370_v54  ;;  %v1381_v63 = vrot.slane %v275_v55, %v422_v56  ;;  %p1064_p11 = scmp.ne.s32.totalorder %s1451_s9, %s1063_s28  ;;  %p1070_p0 = scmp.lt.s32.totalorder %s1451_s9, %s1068_s18 }
  0x1b   : > { %p1071_p1 = scmp.lt.s32.totalorder %s1069_s19, %s1063_s28 }
  0x1c   : > { %405 = vperm.xlu0 %1042, %v280_v0   ;;  %1036 = vset.pattern.permute.xlu1 %v1129_v7  ;;  %p1065_p12 = pnand %p1064_p11, %p1210_p5 }
  0x1d   : > { %296 = vperm.xlu1 %1036, %v278_v6   ;;  %p1072_p2 = por %p1071_p1, %p1070_p0 }
  0x1e   : > { %p1066_p13 = pneg %p1065_p12 }
  0x20   : > { %1046 = vset.pattern.permute.xlu0 %v1130_v8  ;;  %p1073_p3 = pnand %p1072_p2, %p1066_p13 }
  0x21   : > { %441 = vperm.xlu0 %1046, %v276_v1   ;;  %1037 = vset.pattern.permute.xlu1 %v1127_v2 }
  0x22   : > { %345 = vperm.xlu1 %1037, %v278_v6  }
  0x25   : > { %453 = vperm.xlu0 %1046, %v279_v5  }
  0x26   : > { %349 = vperm.xlu1 %1037, %v279_v5  }
  0x29   : > { %457 = vperm.xlu0 %1046, %v280_v0  }
  0x2a   : > { %1038 = vset.pattern.permute.xlu1 %v1130_v8 }
  0x2b   : > { %445 = vperm.xlu1 %1038, %v277_v3  }
  0x2d   : > { %465 = vperm.xlu0 %1046, %v282_v9  }
  0x2f   : > { %1039 = vset.pattern.permute.xlu1 %v1128_v4 }
  0x30   : > { %397 = vperm.xlu1 %1039, %v278_v6  }
  0x31   : > { %1053 = vset.pattern.permute.xlu0 %v1129_v7 }
  0x32   : > { %286 = vperm.xlu0 %1053, %v276_v1  }
  0x34   : > { %1040 = vset.pattern.permute.xlu1 %v1129_v7 }
  0x35   : > { %306 = vperm.xlu1 %1040, %v280_v0   ;;  %v1383_v0 = vrot.slane %v275_v55, %v326_v57 }
  0x36   : > { %291 = vperm.xlu0 %1053, %v277_v3   ;;  %v1386_v3 = vrot.slane %v275_v55, %v474_v61 }
  0x39   : > { %311 = vperm.xlu1 %1040, %v281_v10  }
  0x3a   : > { %301 = vperm.xlu0 %1053, %v279_v5  }
  0x3d   : > { %1043 = vset.pattern.permute.xlu1 %v1127_v2 }
  0x3e   : > { %321 = vperm.xlu0 %1053, %v283_v11   ;;  %357 = vperm.xlu1 %1043, %v281_v10  }
  0x42   : > { %517 = vperm.xlu0 %1053, %v495_v12   ;;  %1044 = vset.pattern.permute.xlu1 %v1130_v8 }
  0x43   : > { %449 = vperm.xlu1 %1044, %v278_v6  }
  0x46   : > { %527 = vperm.xlu0 %1053, %v497_v13  }
  0x47   : > { %1045 = vset.pattern.permute.xlu1 %v1129_v7 }
  0x48   : > { %502 = vperm.xlu1 %1045, %v492_v14  }
  0x4a   : > { %578 = vperm.xlu0 %1053, %v568_v15  }
  0x4c   : > { %507 = vperm.xlu1 %1045, %v493_v16  }
  0x4e   : > { %588 = vperm.xlu0 %1053, %v570_v17  }
  0x50   : > { %1047 = vset.pattern.permute.xlu1 %v1128_v4 }
  0x51   : > { %409 = vperm.xlu1 %1047, %v281_v10  }
  0x52   : > { %598 = vperm.xlu0 %1053, %v572_v18  }
  0x55   : > { %1048 = vset.pattern.permute.xlu1 %v1129_v7 }
  0x56   : > { %316 = vperm.xlu1 %1048, %v282_v9   ;;  %608 = vperm.xlu0 %1053, %v574_v19  }
  0x5a   : > { %1049 = vset.pattern.permute.xlu1 %v1127_v2  ;;  %733 = vperm.xlu0 %1053, %v722_v20  }
  0x5b   : > { %361 = vperm.xlu1 %1049, %v282_v9  }
  0x5e   : > { %743 = vperm.xlu0 %1053, %v1291_v21  }
  0x5f   : > { %365 = vperm.xlu1 %1049, %v283_v11  }
  0x62   : > { %753 = vperm.xlu0 %1053, %v1297_v22  }
  0x63   : > { %1050 = vset.pattern.permute.xlu1 %v1130_v8 }
  0x64   : > { %461 = vperm.xlu1 %1050, %v281_v10  }
  0x66   : > { %763 = vperm.xlu0 %1053, %v1304_v23  }
  0x68   : > { %1051 = vset.pattern.permute.xlu1 %v1129_v7 }
  0x69   : > { %512 = vperm.xlu1 %1051, %v494_v24  }
  0x6a   : > { %1056 = vset.pattern.permute.xlu0 %v1127_v2 }
  0x6b   : > { %806 = vperm.xlu0 %1056, %v722_v20  }
  0x6d   : > { %1052 = vset.pattern.permute.xlu1 %v1128_v4 }
  0x6e   : > { %413 = vperm.xlu1 %1052, %v282_v9   ;;  %v730_v9 = vld [vmem:[%s1497_s6] sm:$0x3] }
  0x6f   : > { %818 = vperm.xlu0 %1056, %v725_v25  }
  0x72   : > { %417 = vperm.xlu1 %1052, %v283_v11  }
  0x73   : > { %826 = vperm.xlu0 %1056, %v727_v26  }
  0x76   : > { %1054 = vset.pattern.permute.xlu1 %v1130_v8 }
  0x77   : > { %469 = vperm.xlu1 %1054, %v283_v11   ;;  %834 = vperm.xlu0 %1056, %v729_v27  }
  0x7b   : > { %1055 = vset.pattern.permute.xlu1 %v1129_v7 }
  0x7c   : > { %522 = vperm.xlu1 %1055, %v496_v28  }
  0x80   : > { %532 = vperm.xlu1 %1055, %v498_v29  }
  0x84   : > { %537 = vperm.xlu1 %1055, %v499_v30  }
  0x88   : > { %583 = vperm.xlu1 %1055, %v569_v31  }
  0x8c   : > { %593 = vperm.xlu1 %1055, %v571_v32  }
  0x8e   : > { %v338_v36 = vpop.permute.xlu1 %337  ;;  %v354_v37 = vpop.permute.xlu0 %353 }
  0x8f   : > { %v376_v62 = vmul.f32 %v1377_v60, %v354_v37  ;;  %v372_v16 = vmul.f32 %v1377_v60, %v338_v36 }
  0x90   : > { %603 = vperm.xlu1 %1055, %v573_v35  }
  0x92   : > { %v342_v39 = vpop.permute.xlu1 %341 }
  0x93   : > { %v390_v40 = vpop.permute.xlu0 %389  ;;  %v373_v18 = vmul.f32 %v1377_v60, %v342_v39 }
  0x94   : > { %613 = vperm.xlu1 %1055, %v575_v38   ;;  %v424_v19 = vmul.f32 %v1381_v63, %v390_v40 }
  0x97   : > { %v394_v42 = vpop.permute.xlu1 %393  ;;  %v1356_v43 = vpop.permute.xlu0 %401 }
  0x98   : > { %738 = vperm.xlu1 %1055, %v723_v41  }
  0x9b   : > { %v406_v44 = vpop.permute.xlu0 %405 }
  0x9c   : > { %748 = vperm.xlu1 %1055, %v725_v25   ;;  %v1358_v45 = vpop.permute.xlu1 %296 }
  0x9d   : > { %v330_v54 = vmul.f32 %v1383_v0, %v1358_v45 }
  0xa0   : > { %758 = vperm.xlu1 %1055, %v727_v26   ;;  %v442_v46 = vpop.permute.xlu0 %441 }
  0xa1   : > { %v1361_v47 = vpop.permute.xlu1 %345 }
  0xa2   : > { %v374_v51 = vmul.f32 %v1377_v60, %v1361_v47 }
  0xa4   : > { %768 = vperm.xlu1 %1055, %v729_v27   ;;  %v1364_v48 = vpop.permute.xlu0 %453  ;;  %v382_v55 = vadd.f32 %v374_v51, %v330_v54 }
  0xa5   : > { %v1366_v50 = vpop.permute.xlu1 %349 }
  0xa6   : > { %v375_v40 = vmul.f32 %v1377_v60, %v1366_v50 }
  0xa8   : > { %1057 = vset.pattern.permute.xlu1 %v1127_v2  ;;  %v458_v52 = vpop.permute.xlu0 %457  ;;  %v428_v2 = vmul.f32 %v1381_v63, %v406_v44 }
  0xa9   : > { %810 = vperm.xlu1 %1057, %v723_v41   ;;  %v480_v6 = vmul.f32 %v1386_v3, %v458_v52  ;;  %v479_v52 = vmul.f32 %v1386_v3, %v1364_v48 }
  0xaa   : > { %v446_v53 = vpop.permute.xlu1 %445 }
  0xab   : > { %v477_v27 = vmul.f32 %v1386_v3, %v446_v53 }
  0xac   : > { %v1373_v58 = vpop.permute.xlu0 %465 }
  0xad   : > { %814 = vperm.xlu1 %1057, %v1291_v21  }
  0xaf   : > { %v1375_v59 = vpop.permute.xlu1 %397 }
  0xb0   : > { %v426_v50 = vmul.f32 %v1381_v63, %v1375_v59 }
  0xb1   : > { %822 = vperm.xlu1 %1057, %v1297_v22   ;;  %v287_v4 = vpop.permute.xlu0 %286 }
  0xb2   : > { %v328_v14 = vmul.f32 %v1383_v0, %v287_v4 }
  0xb4   : > { %v307_v1 = vpop.permute.xlu1 %306  ;;  %v380_v20 = vadd.f32 %v372_v16, %v328_v14 }
  0xb5   : > { %v332_v5 = vmul.f32 %v1383_v0, %v307_v1  ;;  %830 = vperm.xlu1 %1057, %v1304_v23   ;;  %v292_v12 = vpop.permute.xlu0 %291  ;;  %v476_v23 = vmul.f32 %v1386_v3, %v442_v46 }
  0xb6   : > { %v329_v17 = vmul.f32 %v1383_v0, %v292_v12  ;;  %v432_v24 = vadd.f32 %v424_v19, %v380_v20 }
  0xb7   : > { %v384_v8 = vadd.f32 %v376_v62, %v332_v5  ;;  %v434_v62 = vadd.f32 %v426_v50, %v382_v55 }
  0xb8   : > { %v1394_v10 = vpop.permute.xlu1 %311  ;;  %v381_v21 = vadd.f32 %v373_v18, %v329_v17  ;;  %v484_v28 = vadd.f32 %v476_v23, %v432_v24 }
  0xb9   : > { %v436_v11 = vadd.f32 %v428_v2, %v384_v8  ;;  %1058 = vset.pattern.permute.xlu1 %v1129_v7  ;;  %v425_v7 = vmul.f32 %v1381_v63, %v394_v42  ;;  %v302_v37 = vpop.permute.xlu0 %301  ;;  %v427_v42 = vmul.f32 %v1381_v63, %v1356_v43  ;;  %v333_v59 = vmul.f32 %v1383_v0, %v1394_v10 }
  0xba   : > { %800 = vperm.xlu1 %1058, %v730_v9   ;;  %v331_v39 = vmul.f32 %v1383_v0, %v302_v37 }
  0xbb   : > { %v1397_v13 = vadd.f32 %v480_v6, %v436_v11  ;;  %v433_v25 = vadd.f32 %v425_v7, %v381_v21 }
  0xbc   : > { %v383_v44 = vadd.f32 %v375_v40, %v331_v39  ;;  %v1062_v39 = vld [vmem:[%s1494_s3 + $0x18] sm:$0xff]  }
  0xbd   : > { %v358_v15 = vpop.permute.xlu1 %357  ;;  %v485_v30 = vadd.f32 %v477_v27, %v433_v25  ;;  %v322_v46 = vpop.permute.xlu0 %321 }
  0xbe   : > { %v435_v53 = vadd.f32 %v427_v42, %v383_v44  ;;  %v377_v45 = vmul.f32 %v1377_v60, %v358_v15  ;;  %v335_v10 = vmul.f32 %v1383_v0, %v322_v46 }
  0xc0   : > { %v487_v56 = vadd.f32 %v479_v52, %v435_v53  ;;  %v385_v12 = vadd.f32 %v377_v45, %v333_v59 }
  0xc1   : > { %v518_v61 = vpop.permute.xlu0 %517 }
  0xc2   : > { %v450_v22 = vpop.permute.xlu1 %449  ;;  %v543_v1 = vadd.f32 %v518_v61, %v487_v56 }
  0xc3   : > { %v478_v43 = vmul.f32 %v1386_v3, %v450_v22 }
  0xc4   : > { %v551_v5 = vmax.f32 %v543_v1, 0.0 }
  0xc5   : > { %v486_v2 = vadd.f32 %v478_v43, %v434_v62  ;;  %v528_v21 = vpop.permute.xlu0 %527 }
  0xc7   : > { %v503_v26 = vpop.permute.xlu1 %502 }
  0xc8   : > { %v540_v29 = vadd.f32 %v503_v26, %v484_v28  ;;  %v482_v28 = vmul.f32 %v1386_v3, %v1373_v58 }
  0xca   : > { %v548_v33 = vmax.f32 %v540_v29, 0.0 }
  0xcb   : > { %v508_v31 = vpop.permute.xlu1 %507 }
  0xcc   : > { %v541_v32 = vadd.f32 %v508_v31, %v485_v30 }
  0xce   : > { %v549_v34 = vmax.f32 %v541_v32, 0.0 }
  0xd0   : > { %v564_v35 = vpack.c.bf16 %v549_v34, %v548_v33  ;;  %v410_v36 = vpop.permute.xlu1 %409 }
  0xd1   : > { %v429_v9 = vmul.f32 %v1381_v63, %v410_v36 }
  0xd2   : > { %967 = vmatprep.subr.bf16.mxu0 %v564_v35  ;;  %983 = vmatprep.subr.bf16.mxu1 %v564_v35 }
  0xd3   : > { %968 = vmatpush3.bf16.msra.mxu0 %v564_v35  ;;  %987 = vmatpush3.bf16.msra.mxu1 %v564_v35  ;;  %v437_v16 = vadd.f32 %v429_v9, %v385_v12 }
  0xd5   : > { %v317_v38 = vpop.permute.xlu1 %316 }
  0xd6   : > { %v334_v15 = vmul.f32 %v1383_v0, %v317_v38 }
  0xda   : > { %v362_v41 = vpop.permute.xlu1 %361 }
  0xdb   : > { %v378_v17 = vmul.f32 %v1377_v60, %v362_v41  ;;  %v579_v41 = vpop.permute.xlu0 %578 }
  0xdd   : > { %v386_v22 = vadd.f32 %v378_v17, %v334_v15 }
  0xde   : > { %v366_v49 = vpop.permute.xlu1 %365 }
  0xdf   : > { %v379_v7 = vmul.f32 %v1377_v60, %v366_v49  ;;  %v589_v44 = vpop.permute.xlu0 %588 }
  0xe1   : > { %v387_v29 = vadd.f32 %v379_v7, %v335_v10 }
  0xe3   : > { %v462_v57 = vpop.permute.xlu1 %461  ;;  %v599_v49 = vpop.permute.xlu0 %598 }
  0xe4   : > { %v481_v14 = vmul.f32 %v1386_v3, %v462_v57 }
  0xe6   : > { %v489_v18 = vadd.f32 %v481_v14, %v437_v16 }
  0xe7   : > { %v609_v52 = vpop.permute.xlu0 %608 }
  0xe8   : > { %v513_v47 = vpop.permute.xlu1 %512  ;;  %v545_v23 = vadd.f32 %v528_v21, %v489_v18 }
  0xe9   : > { %v542_v4 = vadd.f32 %v513_v47, %v486_v2 }
  0xea   : > { %v553_v32 = vmax.f32 %v545_v23, 0.0 }
  0xeb   : > { %v550_v48 = vmax.f32 %v542_v4, 0.0  ;;  %v734_v54 = vpop.permute.xlu0 %733 }
  0xed   : > { %v565_v6 = vpack.c.bf16 %v551_v5, %v550_v48  ;;  %v414_v8 = vpop.permute.xlu1 %413 }
  0xee   : > { %v430_v20 = vmul.f32 %v1381_v63, %v414_v8 }
  0xef   : > { %969 = vmatprep.subr.bf16.mxu0 %v565_v6  ;;  %984 = vmatprep.subr.bf16.mxu1 %v565_v6  ;;  %v744_v55 = vpop.permute.xlu0 %743 }
  0xf0   : > { %970 = vmatpush3.bf16.msra.mxu0 %v565_v6  ;;  %988 = vmatpush3.bf16.msra.mxu1 %v565_v6  ;;  %v438_v25 = vadd.f32 %v430_v20, %v386_v22 }
  0xf1   : > { %v418_v11 = vpop.permute.xlu1 %417 }
  0xf2   : > { %v431_v26 = vmul.f32 %v1381_v63, %v418_v11  ;;  %v490_v35 = vadd.f32 %v482_v28, %v438_v25 }
  0xf3   : > { %v754_v43 = vpop.permute.xlu0 %753 }
  0xf4   : > { %v439_v0 = vadd.f32 %v431_v26, %v387_v29 }
  0xf6   : > { %v470_v19 = vpop.permute.xlu1 %469 }
  0xf7   : > { %v483_v30 = vmul.f32 %v1386_v3, %v470_v19  ;;  %v1061_v3 = vld [vmem:[%s1494_s3 + $0x8] sm:$0xff]   ;;  %v764_v61 = vpop.permute.xlu0 %763 }
  0xf9   : > { %v491_v36 = vadd.f32 %v483_v30, %v439_v0 }
  0xfb   : > { %v523_v24 = vpop.permute.xlu1 %522  ;;  %v807_v1 = vpop.permute.xlu0 %806 }
  0xfc   : > { %v544_v27 = vadd.f32 %v523_v24, %v1397_v13 }
  0xfe   : > { %v552_v31 = vmax.f32 %v544_v27, 0.0 }
  0xff   : > { %v533_v33 = vpop.permute.xlu1 %532  ;;  %v819_v47 = vpop.permute.xlu0 %818 }
 0x100   : > { %v566_v34 = vpack.c.bf16 %v553_v32, %v552_v31  ;;  %v546_v60 = vadd.f32 %v533_v33, %v490_v35 }
 0x102   : > { %971 = vmatprep.subr.bf16.mxu0 %v566_v34  ;;  %985 = vmatprep.subr.bf16.mxu1 %v566_v34  ;;  %v554_v13 = vmax.f32 %v546_v60, 0.0 }
 0x103   : > { %v538_v37 = vpop.permute.xlu1 %537  ;;  %972 = vmatpush3.bf16.msra.mxu0 %v566_v34  ;;  %989 = vmatpush3.bf16.msra.mxu1 %v566_v34  ;;  %v827_v5 = vpop.permute.xlu0 %826 }
 0x104   : > { %v547_v63 = vadd.f32 %v538_v37, %v491_v36 }
 0x106   : > { %v555_v38 = vmax.f32 %v547_v63, 0.0 }
 0x107   : > { %v584_v40 = vpop.permute.xlu1 %583  ;;  %v835_v60 = vpop.permute.xlu0 %834 }
 0x108   : > { %v567_v58 = vpack.c.bf16 %v555_v38, %v554_v13 }
 0x10a   : > { %973 = vmatprep.subr.bf16.mxu0 %v567_v58  ;;  %986 = vmatprep.subr.bf16.mxu1 %v567_v58 }
 0x10b   : > { %974 = vmatpush3.bf16.msra.mxu0 %v567_v58  ;;  %990 = vmatpush3.bf16.msra.mxu1 %v567_v58  ;;  %v594_v42 = vpop.permute.xlu1 %593 }
 0x10e   : > { %976 = vmatmul.mubr.msk.bf16.vlgmr.msra.gmra.mrb[0].mxu0 %vm636_vm0, %v1061_v3  ;;  %980 = vmatmul.mubr.msk.bf16.vlgmr.msra.gmra.mrb[0].mxu1 %vm636_vm0, %v1062_v39 }
 0x10f   : > { %v604_v46 = vpop.permute.xlu1 %603 }
 0x113   : > { %v614_v51 = vpop.permute.xlu1 %613 }
 0x117   : > { %v739_v53 = vpop.permute.xlu1 %738 }
 0x11b   : > { %v749_v50 = vpop.permute.xlu1 %748 }
 0x11f   : > { %v759_v56 = vpop.permute.xlu1 %758 }
 0x123   : > { %v769_v57 = vpop.permute.xlu1 %768 }
 0x128   : > { %v811_v62 = vpop.permute.xlu1 %810 }
 0x12c   : > { %v815_v2 = vpop.permute.xlu1 %814 }
 0x130   : > { %v823_v4 = vpop.permute.xlu1 %822 }
 0x134   : > { %v831_v10 = vpop.permute.xlu1 %830 }
 0x1e1   : > { %v977_v48 = vpop.f32.mrb[0].mxu0  ;;  %v981_v6 = vpop.f32.mrb[0].mxu1 }
 0x1e2   : > { %v692_v8 = vadd.f32 %v977_v48, %v589_v44  ;;  %v708_v45 = vadd.f32 %v981_v6, %v609_v52  ;;  %v683_v59 = vpop.f32.mrb[1].mxu0  ;;  %v699_v9 = vpop.f32.mrb[1].mxu1 }
 0x1e3   : > { %v684_v11 = vadd.f32 %v683_v59, %v579_v41  ;;  %v700_v12 = vadd.f32 %v699_v9, %v599_v49  ;;  %v978_v14 = vpop.f32.mrb[2].mxu0  ;;  %v982_v16 = vpop.f32.mrb[2].mxu1 }
 0x1e4   : > { %v716_v17 = vmax.f32 %v692_v8, 0.0  ;;  %v720_v18 = vmax.f32 %v708_v45, 0.0  ;;  %v695_v19 = vadd.f32 %v978_v14, %v594_v42  ;;  %v711_v15 = vadd.f32 %v982_v16, %v614_v51  ;;  %v686_v20 = vpop.f32.mrb[3].mxu0  ;;  %v702_v21 = vpop.f32.mrb[3].mxu1 }
 0x1e5   : > { %v714_v22 = vmax.f32 %v684_v11, 0.0  ;;  %v718_v7 = vmax.f32 %v700_v12, 0.0  ;;  %v687_v23 = vadd.f32 %v686_v20, %v584_v40  ;;  %v703_v24 = vadd.f32 %v702_v21, %v604_v46 }
 0x1e6   : > { %v773_v25 = vmul.f32 %v744_v55, %v716_v17  ;;  %v839_v26 = vmul.f32 %v815_v2, %v716_v17  ;;  %v777_v27 = vmul.f32 %v764_v61, %v720_v18  ;;  %v843_v28 = vmul.f32 %v831_v10, %v720_v18 }
 0x1e7   : > { %v771_v29 = vmul.f32 %v734_v54, %v714_v22  ;;  %v837_v30 = vmul.f32 %v807_v1, %v714_v22  ;;  %v775_v31 = vmul.f32 %v754_v43, %v718_v7  ;;  %v841_v32 = vmul.f32 %v823_v4, %v718_v7 }
 0x1e8   : > { %v781_v33 = vadd.f32 %v777_v27, %v773_v25  ;;  %v847_v0 = vadd.f32 %v843_v28, %v839_v26  ;;  %v717_v34 = vmax.f32 %v695_v19, 0.0  ;;  %v721_v35 = vmax.f32 %v711_v15, 0.0 }
 0x1e9   : > { %v779_v36 = vadd.f32 %v775_v31, %v771_v29  ;;  %v845_v37 = vadd.f32 %v841_v32, %v837_v30  ;;  %v715_v63 = vmax.f32 %v687_v23, 0.0  ;;  %v719_v13 = vmax.f32 %v703_v24, 0.0 }
 0x1ea   : > { %v774_v38 = vmul.f32 %v749_v50, %v717_v34  ;;  %v840_v58 = vmul.f32 %v819_v47, %v717_v34  ;;  %v778_v3 = vmul.f32 %v769_v57, %v721_v35  ;;  %v844_v39 = vmul.f32 %v835_v60, %v721_v35 }
 0x1eb   : > { %v783_v40 = vadd.f32 %v781_v33, %v779_v36  ;;  %v849_v41 = vadd.f32 %v847_v0, %v845_v37  ;;  %v772_v42 = vmul.f32 %v739_v53, %v715_v63  ;;  %v838_v44 = vmul.f32 %v811_v62, %v715_v63  ;;  %v801_v62 = vpop.permute.xlu1 %800 }
 0x1ec   : > { %v782_v46 = vadd.f32 %v778_v3, %v774_v38  ;;  %v848_v49 = vadd.f32 %v844_v39, %v840_v58  ;;  %v776_v51 = vmul.f32 %v759_v56, %v719_v13  ;;  %v842_v52 = vmul.f32 %v827_v5, %v719_v13 }
 0x1ed   : > { %v864_v45 = vrot.slane %v801_v62, 1 }
 0x1ee   : > { %v780_v54 = vadd.f32 %v776_v51, %v772_v42  ;;  %v846_v55 = vadd.f32 %v842_v52, %v838_v44 }
 0x1f0   : > { %v784_v43 = vadd.f32 %v782_v46, %v780_v54  ;;  %v850_v61 = vadd.f32 %v848_v49, %v846_v55 }
 0x1f2   : > { %v851_v1 = vadd.f32 %v850_v61, %v849_v41  ;;  %v785_v2 = vadd.f32 %v784_v43, %v783_v40 }
 0x1f4   : > { %v787_v50 = vrot.slane %v785_v2, 4  ;;  %v853_v57 = vrot.slane %v851_v1, 4 }
 0x1f6   : > { %v789_v47 = vadd.f32 %v787_v50, %v785_v2  ;;  %v855_v4 = vadd.f32 %v853_v57, %v851_v1 }
 0x1f8   : > { %v791_v48 = vrot.slane %v789_v47, 2  ;;  %v857_v53 = vrot.slane %v855_v4, 2 }
 0x1fa   : > { %v793_v6 = vadd.f32 %v791_v48, %v789_v47  ;;  %v859_v8 = vadd.f32 %v857_v53, %v855_v4 }
 0x1fc   : > { %v795_v56 = vrot.slane %v793_v6, 1  ;;  %v861_v5 = vrot.slane %v859_v8, 1 }
 0x1fe   : > { %v797_v59 = vadd.f32 %v795_v56, %v793_v6  ;;  %v863_v9 = vadd.f32 %v861_v5, %v859_v8 }
 0x200   : > { %v803_v11 = vadd.f32 %v801_v62, %v797_v59  ;;  %v866_v12 = vadd.f32 %v864_v45, %v863_v9 }
 0x202   : > { %804 = vst [vmem:[%s269_s8] sm:$0x1] %v803_v11  ;;  %867 = vst [vmem:[%s269_s8 + $0x1] sm:$0x1] %v866_v12 }
 0x203   : > { %1076 = shalt.err (!%p1073_p3)
}
 0x204   : > { %s1077_s20 = scalar_lea.hbm %s1449_s15, 32  ;;  %s1081_s23 = scalar_lea.hbm %s1498_s7, 64 }
 0x205   : > { %p1078_p4 = scmp.ne.s32.totalorder %s1449_s15, %s1077_s20  ;;  %p1082_p9 = scmp.lt.u32.totalorder %s1449_s15, %s1498_s7 }
 0x206   : > { %p1083_p10 = scmp.lt.u32.totalorder %s1081_s23, %s1077_s20  ;;  %p1085_p12 = scmp.lt.u32.totalorder %s1077_s20, %s1449_s15 }
 0x207   : > { %p1079_p7 = pnand %p1078_p4, %p1210_p5 }
 0x208   : > { %p1084_p11 = por %p1083_p10, %p1082_p9 }
 0x209   : > { %p1080_p8 = pneg %p1079_p7 }
 0x20a   : > { %p1086_p13 = por %p1085_p12, %p1084_p11 }
 0x20c   : > { %p1087_p0 = pnand %p1086_p13, %p1080_p8 }
 0x20e   : > { %1090 = shalt.err (!%p1087_p0)
}
 0x20f   : > { %991 = dma.vmem_to_hbm [thread:$0]  (%p1210_p5), %s1451_s9, 32, %s1449_s15, %s869_s16  }
 0x210 PF: > { %p997_p1 = scmp.ge.s32.totalorder %s1125_s27, 2  ;;  %s894_s13 = sand.u32 1, %s1113_s24  }
 0x211   : > { %s895_s14 = scalar_lea.sflag [#allocation3], %s894_s13 }
 0x212   : > { %p994_p2 = pnand %p997_p1, %p1214_p6 }
 0x214   : > { %1108 = dma.done.wait (!%p994_p2), %s895_s14, 32  }
 0x215   : > { %1110 = vsyncadd (!%p994_p2), %s895_s14, 4294967264  ;;  %p17_p3 = scmp.ge.s32.totalorder %s1197_s30, 4   ;;  %s1501_s24 = smov %s1117_s25 }
 0x216   : > { %s1502_s25 = smov %s1121_s26  ;;  %s1503_s26 = smov %s1208_s10 }
 0x217   : > { %s1504_s27 = smov %s1197_s30  ;;  %19 = sbr.rel (!%p17_p3) target bundleno = 3 (0x3), region = 83 }
 0x21e   :  { %900 = vsyncpa [#allocation3], 1 }
 0x21f   :  { %902 = vsyncpa [#allocation3 + $0x1], 1 }

</bundles_post_ra>
